<compile_context>
chip_gen: v6e
topology: v6e:2x2x1
jax: 0.10.0
libtpu: 0.0.40
codegen_flags: <defaults>
</compile_context>

<pallas_src>
import functools

import jax
import jax.numpy as jnp
from jax.experimental import pallas as pl
from jax.experimental.pallas import tpu as pltpu


def _round_up(x, m):
    return ((x + m - 1) // m) * m


def _matmul_bias_kernel(x_ref, w_ref, b_ref, o_ref):
    # x_ref : (tile_m, K)      activation row-tile
    # w_ref : (K, N_out)       fused [Wq | Wk | Wv] weight (VMEM-resident)
    # b_ref : (1, N_out)       fused bias
    # o_ref : (tile_m, N_out)  lane-dense output tile
    acc = jnp.dot(x_ref[...], w_ref[...], preferred_element_type=jnp.float32)
    acc = acc + b_ref[...].astype(jnp.float32)
    o_ref[...] = acc.astype(o_ref.dtype)


def _matmul_bias(x2d, w, b2d, *, tile_m=512):
    """Computes x2d @ w + b2d with a row-tiled Pallas kernel.

    x2d: (M, K); w: (K, N_out); b2d: (1, N_out)  ->  (M, N_out)
    """
    M, K = x2d.shape
    _, N_out = w.shape

    tile_m = min(tile_m, _round_up(M, 8))
    M_pad = _round_up(M, tile_m)
    if M_pad != M:
        x2d = jnp.pad(x2d, ((0, M_pad - M), (0, 0)))
    grid = (M_pad // tile_m,)

    out = pl.pallas_call(
        _matmul_bias_kernel,
        out_shape=jax.ShapeDtypeStruct((M_pad, N_out), x2d.dtype),
        grid_spec=pltpu.PrefetchScalarGridSpec(
            num_scalar_prefetch=0,
            grid=grid,
            in_specs=[
                pl.BlockSpec((tile_m, K), lambda i: (i, 0)),
                pl.BlockSpec((K, N_out), lambda i: (0, 0)),
                pl.BlockSpec((1, N_out), lambda i: (0, 0)),
            ],
            out_specs=pl.BlockSpec((tile_m, N_out), lambda i: (i, 0)),
        ),
        compiler_params=pltpu.CompilerParams(
            dimension_semantics=("parallel",),
            vmem_limit_bytes=64 * 1024 * 1024,
        ),
    )(x2d, w, b2d)

    return out[:M]


def linear_projection(x, wq, bq, wkv, bkv, *, heads, attn_kv=None):
    """Faithful forward of LinearProjection.

    x      : (B, N, C)
    wq     : (inner_dim, C), bq: (inner_dim,)          (PyTorch Linear layout)
    wkv    : (2*inner_dim, C), bkv: (2*inner_dim,)
    attn_kv: optional (N_kv, C) shared across batch (as in the PyTorch module)
    returns q, k, v each of shape (B, heads, N[_kv], C // heads)
    """
    B, N, C = x.shape
    inner_dim = wq.shape[0]
    head_dim = C // heads  # matches the PyTorch reshape (uses C // heads)
    assert inner_dim == heads * head_dim, "inner_dim must equal heads*(C//heads)"

    def split_heads(t, n_tok):
        # (B*n_tok, inner_dim) -> (B, heads, n_tok, head_dim)
        return t.reshape(B, n_tok, heads, head_dim).transpose(0, 2, 1, 3)

    if attn_kv is None:
        # Fuse q, k, v into one (C, 3*inner_dim) GEMM.
        w_cat = jnp.concatenate([wq.T, wkv.T], axis=1)           # (C, 3*inner)
        b_cat = jnp.concatenate([bq, bkv]).reshape(1, -1)        # (1, 3*inner)
        out = _matmul_bias(x.reshape(B * N, C), w_cat, b_cat)    # (B*N, 3*inner)
        q = split_heads(out[:, :inner_dim], N)
        k = split_heads(out[:, inner_dim:2 * inner_dim], N)
        v = split_heads(out[:, 2 * inner_dim:], N)
        return q, k, v

    # Cross-attention path: kv comes from a shared (N_kv, C) tensor; the
    # PyTorch code repeats it over batch, so compute it once and broadcast.
    N_kv = attn_kv.shape[0]
    q = _matmul_bias(x.reshape(B * N, C), wq.T, bq.reshape(1, -1))
    q = split_heads(q, N)
    kv = _matmul_bias(attn_kv, wkv.T, bkv.reshape(1, -1))        # (N_kv, 2*inner)
    kv = kv.reshape(N_kv, 2, heads, head_dim).transpose(1, 2, 0, 3)  # (2,h,Nkv,d)
    k = jnp.broadcast_to(kv[0][None], (B, heads, N_kv, head_dim))
    v = jnp.broadcast_to(kv[1][None], (B, heads, N_kv, head_dim))
    return q, k, v


def _reference(x, wq, bq, wkv, bkv, heads, attn_kv=None):
    """Pure-JAX replica of the PyTorch forward."""
    B, N, C = x.shape
    if attn_kv is None:
        akv = x
    else:
        akv = jnp.broadcast_to(attn_kv[None], (B,) + attn_kv.shape)
    N_kv = akv.shape[1]
    q = x @ wq.T + bq
    kv = akv @ wkv.T + bkv
    head_dim = C // heads
    q = q.reshape(B, N, 1, heads, head_dim).transpose(2, 0, 3, 1, 4)[0]
    kv = kv.reshape(B, N_kv, 2, heads, head_dim).transpose(2, 0, 3, 1, 4)
    return q, kv[0], kv[1]


if __name__ == "__main__":
    # Module config consistent with its use: dim=32, heads=8, dim_head=dim//heads=4
    # (required so the reshape with C // heads is valid), batch=2, seq=8.
    B, N, dim, heads = 2, 8, 32, 8
    dim_head = dim // heads
    inner_dim = heads * dim_head

    key = jax.random.PRNGKey(0)
    kx, kwq, kbq, kwkv, kbkv = jax.random.split(key, 5)
    x = jax.random.normal(kx, (B, N, dim), dtype=jnp.float32)
    wq = jax.random.normal(kwq, (inner_dim, dim), dtype=jnp.float32) * 0.1
    bq = jax.random.normal(kbq, (inner_dim,), dtype=jnp.float32) * 0.1
    wkv = jax.random.normal(kwkv, (2 * inner_dim, dim), dtype=jnp.float32) * 0.1
    bkv = jax.random.normal(kbkv, (2 * inner_dim,), dtype=jnp.float32) * 0.1

    q, k, v = linear_projection(x, wq, bq, wkv, bkv, heads=heads)
    q, k, v = jax.block_until_ready((q, k, v))

    q_ref, k_ref, v_ref = _reference(x, wq, bq, wkv, bkv, heads)
    assert q.shape == (B, heads, N, dim // heads)
    assert k.shape == (B, heads, N, dim // heads)
    assert v.shape == (B, heads, N, dim // heads)
    assert jnp.allclose(q, q_ref, atol=1e-4, rtol=1e-4), "q mismatch vs reference"
    assert jnp.allclose(k, k_ref, atol=1e-4, rtol=1e-4), "k mismatch vs reference"
    assert jnp.allclose(v, v_ref, atol=1e-4, rtol=1e-4), "v mismatch vs reference"

    print("KERNEL_OK")
</pallas_src>

<mosaic_0001>
module attributes {stable_mosaic.version = 11 : i64} {
  func.func @_matmul_bias_kernel(%arg0: i32, %arg1: memref<16x32xf32, #tpu.memory_space<vmem>>, %arg2: memref<32x96xf32, #tpu.memory_space<vmem>>, %arg3: memref<1x96xf32, #tpu.memory_space<vmem>>, %arg4: memref<16x96xf32, #tpu.memory_space<vmem>>) attributes {dimension_semantics = [#tpu.dimension_semantics<parallel>], iteration_bounds = array<i64: 1>, scalar_prefetch = 0 : i64, scratch_operands = 0 : i64, tpu.core_type = #tpu.core_type<tc>, window_params = [{transform_indices = @transform_0, window_bounds = array<i64: 16, 32>}, {pipeline_mode = #tpu.pipeline_mode<synchronous>, transform_indices = @transform_1, window_bounds = array<i64: 32, 96>}, {pipeline_mode = #tpu.pipeline_mode<synchronous>, transform_indices = @transform_2, window_bounds = array<i64: 1, 96>}, {transform_indices = @transform_3, window_bounds = array<i64: 16, 96>}]} {
    %c0 = arith.constant 0 : index
    %c0_0 = arith.constant 0 : index
    %0 = vector.load %arg1[%c0, %c0_0] : memref<16x32xf32, #tpu.memory_space<vmem>>, vector<16x32xf32>
    %c0_1 = arith.constant 0 : index
    %c0_2 = arith.constant 0 : index
    %1 = vector.load %arg2[%c0_1, %c0_2] : memref<32x96xf32, #tpu.memory_space<vmem>>, vector<32x96xf32>
    %cst = arith.constant dense<0.000000e+00> : vector<16x96xf32>
    %2 = tpu.matmul %0, %1, %cst {dimension_numbers = #tpu.dot_dimension_numbers<[1], [0], [0], [1], [0, 0, 1, 1], [], []>} : vector<16x32xf32>, vector<32x96xf32>, vector<16x96xf32> -> vector<16x96xf32>
    %c0_3 = arith.constant 0 : index
    %c0_4 = arith.constant 0 : index
    %3 = vector.load %arg3[%c0_3, %c0_4] : memref<1x96xf32, #tpu.memory_space<vmem>>, vector<1x96xf32>
    %4 = vector.broadcast %3 : vector<1x96xf32> to vector<16x96xf32>
    %5 = arith.addf %2, %4 : vector<16x96xf32>
    %c0_5 = arith.constant 0 : index
    %c0_6 = arith.constant 0 : index
    %6 = vector.load %arg4[%c0_5, %c0_6] : memref<16x96xf32, #tpu.memory_space<vmem>>, vector<16x96xf32>
    tpu.vector_store %arg4[%c0_5, %c0_6], %5 {strides = array<i32>} : memref<16x96xf32, #tpu.memory_space<vmem>>, vector<16x96xf32>,
    return
  }
  func.func @transform_0(%arg0: i32) -> (i32, i32) {
    %c0_i32 = arith.constant 0 : i32
    %c0_i32_0 = arith.constant 0 : i32
    return %arg0, %c0_i32 : i32, i32
  }
  func.func @transform_1(%arg0: i32) -> (i32, i32) {
    %c0_i32 = arith.constant 0 : i32
    %c0_i32_0 = arith.constant 0 : i32
    %c0_i32_1 = arith.constant 0 : i32
    return %c0_i32, %c0_i32_0 : i32, i32
  }
  func.func @transform_2(%arg0: i32) -> (i32, i32) {
    %c0_i32 = arith.constant 0 : i32
    %c0_i32_0 = arith.constant 0 : i32
    %c0_i32_1 = arith.constant 0 : i32
    return %c0_i32, %c0_i32_0 : i32, i32
  }
  func.func @transform_3(%arg0: i32) -> (i32, i32) {
    %c0_i32 = arith.constant 0 : i32
    %c0_i32_0 = arith.constant 0 : i32
    return %arg0, %c0_i32 : i32, i32
  }
}

</mosaic_0001>

<bundles_post_ra>
// kernel: tpu_custom_call.1
= control target key start
LH: loop header
LB: loop body
LE: loop exit
PB: predicated region body
PF: predicated region fallthrough
CT: control target
= control target key end

     0   :  { %8 = vsyncpa [#allocation3], 0  ;;  %s298_s0 = inlined_call_operand.hbm [shape: f32[16,32], index: 0, kind: input, shape index: {}]   ;;  %s299_s1 = inlined_call_operand.hbm [shape: f32[32,96], index: 1, kind: input, shape index: {}]   ;;  %s300_s2 = inlined_call_operand.vmem [shape: f32[1,96], index: 2, kind: input, shape index: {}]   ;;  %s301_s3 = inlined_call_operand.hbm [shape: f32[16,96], index: 3, kind: output, shape index: {}]  }
   0x1   :  { %9 = vsyncpa [#allocation6], 0 }
   0x2   :  { %10 = vsyncpa [#allocation4], 0  ;;  %s250_s12 = smov [#allocation2]  }
   0x3   :  { %s16_s13 = sshll.u32 %s250_s12, 4  ;;  %s17_s13 = int_to_ptr.vmem [resolvable:$true] %s16_s13 }
   0x4   :  { %s192_s14 = scalar_lea.vmem %s17_s13, 256  ;;  %p197_p1 = scmp.lt.s32.totalorder %s17_s13, %s17_s13 }
   0x5   :  { %p193_p0 = scmp.ne.s32.totalorder %s17_s13, %s192_s14  ;;  %p198_p2 = scmp.lt.s32.totalorder %s192_s14, %s192_s14 }
   0x7   :  { %p199_p3 = por %p198_p2, %p197_p1 }
   0x9   :  { %p200_p4 = pnand %p199_p3, %p193_p0 }
   0xb   :  { %203 = shalt.err (!%p200_p4)
}
   0xc   :  { %s251_s15 = smov 128   ;;  %s252_s16 = smov 8  }
   0xd   :  { %22 = dma.hbm_to_vmem [thread:$0]  %s298_s0, 256, %s17_s13, [#allocation3], %s251_s15, %s251_s15, %s252_s16  }
   0xe   :  { %s253_s19 = smov [#allocation5]  }
   0xf   :  { %s28_s20 = sshll.u32 %s253_s19, 4  ;;  %s29_s20 = int_to_ptr.vmem [resolvable:$true] %s28_s20 }
  0x10   :  { %s212_s21 = scalar_lea.vmem %s29_s20, 512  ;;  %p217_p6 = scmp.lt.s32.totalorder %s29_s20, %s29_s20 }
  0x11   :  { %p213_p5 = scmp.ne.s32.totalorder %s29_s20, %s212_s21  ;;  %p218_p7 = scmp.lt.s32.totalorder %s212_s21, %s212_s21 }
  0x13   :  { %p219_p8 = por %p218_p7, %p217_p6 }
  0x15   :  { %p220_p9 = pnand %p219_p8, %p213_p5 }
  0x17   :  { %223 = shalt.err (!%p220_p9)
}
  0x18   :  { %34 = dma.hbm_to_vmem [thread:$0]  %s299_s1, 512, %s29_s20, [#allocation6], %s251_s15, %s251_s15, %s252_s16  }
  0x19   :  { %244 = dma.done.wait [#allocation3], 256  }
  0x1a   :  { %245 = vsyncadd [#allocation3], 4294967040 }
  0x1b   :  { %246 = dma.done.wait [#allocation6], 512  }
  0x1c   :  { %247 = vsyncadd [#allocation6], 4294966784  ;;  %vm56_vm0 = vcmask 261120   ;;  %v48_v0 = vld [vmem:[#allocation5 + $0x18] sm:$0xff]  ;;  %v47_v1 = vld [vmem:[#allocation5 + $0x10] sm:$0xff]  ;;  %vm138_vm1 = vcmask 785408  }
  0x1d   :  { %168 = vmatprep.subr.mxu0 %v48_v0  ;;  %v43_v2 = vld [vmem:[#allocation2] sm:$0xff]  ;;  %v46_v3 = vld [vmem:[#allocation5 + $0x8] sm:$0xff]  ;;  %v45_v4 = vld [vmem:[#allocation5] sm:$0xff]  ;;  %s254_s24 = smov [#allocation7]  }
  0x1e   :  { %169 = vmatpush3.msra.mxu0 %v48_v0  ;;  %176 = vmatprep.mubr.msk.f32.mxu0 %vm56_vm0, %v43_v2  ;;  %v44_v5 = vld [vmem:[#allocation2 + $0x8] sm:$0xff]  ;;  %v159_v6 = vld [vmem:[%s300_s2] ss:$0 sm:$0xff]  ;;  %s146_s25 = sshll.u32 %s254_s24, 4  ;;  %s147_s25 = int_to_ptr.vmem [resolvable:$true] %s146_s25 }
  0x1f   :  { %170 = vmatprep.subr.mxu0 %v47_v1  ;;  %s224_s26 = scalar_lea.vmem %s147_s25, 256  ;;  %p229_p11 = scmp.lt.s32.totalorder %s147_s25, %s147_s25 }
  0x20   :  { %171 = vmatpush3.msra.mxu0 %v47_v1  ;;  %p225_p10 = scmp.ne.s32.totalorder %s147_s25, %s224_s26  ;;  %p230_p12 = scmp.lt.s32.totalorder %s224_s26, %s224_s26 }
  0x21   :  { %172 = vmatprep.subr.mxu0 %v46_v3 }
  0x22   :  { %173 = vmatpush3.msra.mxu0 %v46_v3  ;;  %p231_p13 = por %p230_p12, %p229_p11 }
  0x23   :  { %174 = vmatprep.subr.mxu0 %v45_v4 }
  0x24   :  { %175 = vmatpush3.msra.mxu0 %v45_v4  ;;  %p232_p0 = pnand %p231_p13, %p225_p10 }
  0x25   :  { %177 = vmatmul.mubr.msk.f32.vlgmr.msra.gmra.mxu0 %vm56_vm0, %v44_v5 }
  0xe5   :  { %v178_v7 = vpop.f32.mrf.mxu0 }
  0xe6   :  { %v135_v8 = vadd.f32 %v178_v7, %v159_v6 }
  0xe7   :  { %v129_v9 = vpop.f32.mrf.mxu0 }
  0xe8   :  { %v130_v10 = vadd.f32 %v159_v6, %v129_v9  ;;  %140 = vst.msk [vmem:[#allocation7 + $0x8] sm:$0xff] %vm138_vm1, %v135_v8 }
  0xea   :  { %139 = vst.msk [vmem:[#allocation7] sm:$0xff] %vm138_vm1, %v130_v10 }
  0xeb   :  { %235 = shalt.err (!%p232_p0)
}
  0xec   :  { %152 = dma.vmem_to_hbm [thread:$0]  %s147_s25, 256, %s301_s3, [#allocation4], %s251_s15, %s251_s15, %s252_s16  }
  0xed   :  { %248 = dma.done.wait [#allocation4], 256  }
  0xee   :  { %249 = vsyncadd [#allocation4], 4294967040 }
  0xef   :  { %156 = vsyncpa [#allocation3], 1 }
  0xf0   :  { %157 = vsyncpa [#allocation6], 1 }
  0xf1   :  { %158 = vsyncpa [#allocation4], 1 }

</bundles_post_ra>
